<compile_context>
chip_gen: v7x
topology: tpu7x:2x2x1
jax: 0.10.0
libtpu: 0.0.40
codegen_flags: <defaults>
</compile_context>

<pallas_src>
import jax
import jax.numpy as jnp
from jax import lax
from jax.experimental import pallas as pl
from jax.experimental.pallas import tpu as pltpu


def _dual_embed_kernel(ids_ref, stat_ref, nonstat_ref, out_s_ref, out_ns_ref):
    # ids_ref     : VMEM (T, 1)  int32 token-id tile for this grid step
    # stat_ref    : VMEM (V, D)  resident static table (same block every step)
    # nonstat_ref : VMEM (V, D)  resident non-static table
    # out_s_ref   : VMEM (T, D)  static-embedding output tile
    # out_ns_ref  : VMEM (T, D)  non-static-embedding output tile
    V, D = stat_ref.shape
    T = out_s_ref.shape[0]

    # Clamp ids so OOB values never index past the table (VMEM reads are unchecked).
    ids = jnp.clip(ids_ref[...], 0, V - 1)  # (T, 1) int32

    v_chunk = min(V, 512)                   # multiple of 256 for full MXU tiles
    n_chunks = (V + v_chunk - 1) // v_chunk # static (V known at trace time)

    acc_s = jnp.zeros((T, D), jnp.float32)
    acc_ns = jnp.zeros((T, D), jnp.float32)
    for c in range(n_chunks):               # short static loop over vocab chunks
        base = c * v_chunk
        size = min(v_chunk, V - base)
        iota = base + lax.broadcasted_iota(jnp.int32, (T, size), 1)
        onehot = (iota == ids).astype(jnp.float32)   # (T, size), exact 0/1
        acc_s = acc_s + jnp.dot(onehot, stat_ref[base:base + size, :],
                                preferred_element_type=jnp.float32)
        acc_ns = acc_ns + jnp.dot(onehot, nonstat_ref[base:base + size, :],
                                  preferred_element_type=jnp.float32)

    out_s_ref[...] = acc_s.astype(out_s_ref.dtype)
    out_ns_ref[...] = acc_ns.astype(out_ns_ref.dtype)


def dual_word_embedding(ids, static_table, non_static_table, *, block_tokens=512):
    """ids: int (B, S); tables: float32 (V, D) -> ((B, S, D), (B, S, D))."""
    B, S = ids.shape
    V, D = static_table.shape
    N = B * S

    # Tokens per grid step: multiple of 8 (sublane-dense tiles); prefer >= 2 blocks
    # so the parallel grid axis can be sharded across both TensorCores on v7x.
    half = (((N + 1) // 2) + 7) // 8 * 8
    T = max(8, min(block_tokens, half))
    n_blocks = pl.cdiv(N, T)
    N_pad = n_blocks * T

    flat_ids = ids.reshape(N, 1).astype(jnp.int32)
    if N_pad != N:
        flat_ids = jnp.pad(flat_ids, ((0, N_pad - N), (0, 0)))  # pad with valid id 0

    # Explicit VMEM budget: two single-buffered resident tables + double-buffered
    # ids / output tiles + in-register one-hot & accumulator slack.  Cap at 64 MiB
    # (v7x physical VMEM).
    table_bytes = 2 * V * D * 4
    io_bytes = 2 * (T * 4) + 2 * 2 * (T * D * 4)
    scratch_bytes = 4 * T * max(min(V, 512), D) * 4
    vmem_limit = min(64 * 1024 * 1024,
                     max(16 * 1024 * 1024,
                         2 * (table_bytes + io_bytes + scratch_bytes)))

    out_s, out_ns = pl.pallas_call(
        _dual_embed_kernel,
        grid=(n_blocks,),
        in_specs=[
            pl.BlockSpec((T, 1), lambda i: (i, 0)),
            pl.BlockSpec((V, D), lambda i: (0, 0), pipeline_mode=pl.Buffered(1)),
            pl.BlockSpec((V, D), lambda i: (0, 0), pipeline_mode=pl.Buffered(1)),
        ],
        out_specs=[
            pl.BlockSpec((T, D), lambda i: (i, 0)),
            pl.BlockSpec((T, D), lambda i: (i, 0)),
        ],
        out_shape=[
            jax.ShapeDtypeStruct((N_pad, D), static_table.dtype),
            jax.ShapeDtypeStruct((N_pad, D), non_static_table.dtype),
        ],
        compiler_params=pltpu.CompilerParams(
            dimension_semantics=("parallel",),
            vmem_limit_bytes=vmem_limit),
    )(flat_ids, static_table, non_static_table)

    if N_pad != N:
        out_s = out_s[:N]
        out_ns = out_ns[:N]
    return out_s.reshape(B, S, D), out_ns.reshape(B, S, D)


if __name__ == "__main__":
    # Deterministic synthetic parameters (PyTorch Embedding init ~ N(0, 1)).
    vocab_size = 64
    embedding_dim = 128
    batch, seq = 2, 8

    key = jax.random.PRNGKey(0)
    k_static, k_non_static, k_ids = jax.random.split(key, 3)

    static_table = jax.random.normal(
        k_static, (vocab_size, embedding_dim), dtype=jnp.float32)
    non_static_table = jax.random.normal(
        k_non_static, (vocab_size, embedding_dim), dtype=jnp.float32)
    ids = jax.random.randint(
        k_ids, (batch, seq), 0, vocab_size, dtype=jnp.int32)

    static_emb, non_static_emb = dual_word_embedding(
        ids, static_table, non_static_table)
    jax.block_until_ready((static_emb, non_static_emb))

    # Reference check against plain JAX gather (same semantics as torch.nn.Embedding).
    ref_static = static_table[ids]
    ref_non_static = non_static_table[ids]
    assert static_emb.shape == (batch, seq, embedding_dim)
    assert non_static_emb.shape == (batch, seq, embedding_dim)
    assert jnp.allclose(static_emb, ref_static)
    assert jnp.allclose(non_static_emb, ref_non_static)

    print("KERNEL_OK")
</pallas_src>

<mosaic_0001>
module attributes {stable_mosaic.version = 11 : i64} {
  func.func @_dual_embed_kernel(%arg0: i32, %arg1: memref<8x1xi32, #tpu.memory_space<vmem>>, %arg2: memref<64x128xf32, #tpu.memory_space<vmem>>, %arg3: memref<64x128xf32, #tpu.memory_space<vmem>>, %arg4: memref<8x128xf32, #tpu.memory_space<vmem>>, %arg5: memref<8x128xf32, #tpu.memory_space<vmem>>) attributes {dimension_semantics = [#tpu.dimension_semantics<parallel>], iteration_bounds = array<i64: 2>, scalar_prefetch = 0 : i64, scratch_operands = 0 : i64, tpu.core_type = #tpu.core_type<tc>, window_params = [{transform_indices = @transform_0, window_bounds = array<i64: 8, 1>}, {pipeline_mode = #tpu.pipeline_mode<synchronous>, transform_indices = @transform_1, window_bounds = array<i64: 64, 128>}, {pipeline_mode = #tpu.pipeline_mode<synchronous>, transform_indices = @transform_2, window_bounds = array<i64: 64, 128>}, {transform_indices = @transform_3, window_bounds = array<i64: 8, 128>}, {transform_indices = @transform_4, window_bounds = array<i64: 8, 128>}]} {
    %c0 = arith.constant 0 : index
    %c0_0 = arith.constant 0 : index
    %0 = vector.load %arg1[%c0, %c0_0] : memref<8x1xi32, #tpu.memory_space<vmem>>, vector<8x1xi32>
    %c0_i32 = arith.constant 0 : i32
    %c63_i32 = arith.constant 63 : i32
    %1 = vector.broadcast %c0_i32 : i32 to vector<8x1xi32>
    %2 = arith.maxsi %1, %0 : vector<8x1xi32>
    %3 = vector.broadcast %c63_i32 : i32 to vector<8x1xi32>
    %4 = arith.minsi %3, %2 : vector<8x1xi32>
    %cst = arith.constant 0.000000e+00 : f32
    %5 = vector.broadcast %cst : f32 to vector<8x128xf32>
    %cst_1 = arith.constant 0.000000e+00 : f32
    %6 = vector.broadcast %cst_1 : f32 to vector<8x128xf32>
    %7 = tpu.iota {dimensions = array<i32: 1>} : vector<8x64xi32>
    %c0_i32_2 = arith.constant 0 : i32
    %8 = vector.broadcast %c0_i32_2 : i32 to vector<8x64xi32>
    %9 = arith.addi %8, %7 : vector<8x64xi32>
    %10 = vector.broadcast %4 : vector<8x1xi32> to vector<8x64xi32>
    %11 = arith.cmpi eq, %9, %10 : vector<8x64xi32>
    %12 = arith.extui %11 : vector<8x64xi1> to vector<8x64xi32>
    %13 = arith.sitofp %12 : vector<8x64xi32> to vector<8x64xf32>
    %c0_3 = arith.constant 0 : index
    %c0_4 = arith.constant 0 : index
    %14 = vector.load %arg2[%c0_3, %c0_4] : memref<64x128xf32, #tpu.memory_space<vmem>>, vector<64x128xf32>
    %cst_5 = arith.constant dense<0.000000e+00> : vector<8x128xf32>
    %15 = tpu.matmul %13, %14, %cst_5 {dimension_numbers = #tpu.dot_dimension_numbers<[1], [0], [0], [1], [0, 0, 1, 1], [], []>} : vector<8x64xf32>, vector<64x128xf32>, vector<8x128xf32> -> vector<8x128xf32>
    %16 = arith.addf %5, %15 : vector<8x128xf32>
    %c0_6 = arith.constant 0 : index
    %c0_7 = arith.constant 0 : index
    %17 = vector.load %arg3[%c0_6, %c0_7] : memref<64x128xf32, #tpu.memory_space<vmem>>, vector<64x128xf32>
    %cst_8 = arith.constant dense<0.000000e+00> : vector<8x128xf32>
    %18 = tpu.matmul %13, %17, %cst_8 {dimension_numbers = #tpu.dot_dimension_numbers<[1], [0], [0], [1], [0, 0, 1, 1], [], []>} : vector<8x64xf32>, vector<64x128xf32>, vector<8x128xf32> -> vector<8x128xf32>
    %19 = arith.addf %6, %18 : vector<8x128xf32>
    %c0_9 = arith.constant 0 : index
    %c0_10 = arith.constant 0 : index
    %20 = vector.load %arg4[%c0_9, %c0_10] : memref<8x128xf32, #tpu.memory_space<vmem>>, vector<8x128xf32>
    tpu.vector_store %arg4[%c0_9, %c0_10], %16 {strides = array<i32>} : memref<8x128xf32, #tpu.memory_space<vmem>>, vector<8x128xf32>,
    %c0_11 = arith.constant 0 : index
    %c0_12 = arith.constant 0 : index
    %21 = vector.load %arg5[%c0_11, %c0_12] : memref<8x128xf32, #tpu.memory_space<vmem>>, vector<8x128xf32>
    tpu.vector_store %arg5[%c0_11, %c0_12], %19 {strides = array<i32>} : memref<8x128xf32, #tpu.memory_space<vmem>>, vector<8x128xf32>,
    return
  }
  func.func @transform_0(%arg0: i32) -> (i32, i32) {
    %c0_i32 = arith.constant 0 : i32
    %c0_i32_0 = arith.constant 0 : i32
    return %arg0, %c0_i32 : i32, i32
  }
  func.func @transform_1(%arg0: i32) -> (i32, i32) {
    %c0_i32 = arith.constant 0 : i32
    %c0_i32_0 = arith.constant 0 : i32
    %c0_i32_1 = arith.constant 0 : i32
    return %c0_i32, %c0_i32_0 : i32, i32
  }
  func.func @transform_2(%arg0: i32) -> (i32, i32) {
    %c0_i32 = arith.constant 0 : i32
    %c0_i32_0 = arith.constant 0 : i32
    %c0_i32_1 = arith.constant 0 : i32
    return %c0_i32, %c0_i32_0 : i32, i32
  }
  func.func @transform_3(%arg0: i32) -> (i32, i32) {
    %c0_i32 = arith.constant 0 : i32
    %c0_i32_0 = arith.constant 0 : i32
    return %arg0, %c0_i32 : i32, i32
  }
  func.func @transform_4(%arg0: i32) -> (i32, i32) {
    %c0_i32 = arith.constant 0 : i32
    %c0_i32_0 = arith.constant 0 : i32
    return %arg0, %c0_i32 : i32, i32
  }
}

</mosaic_0001>

<bundles_post_ra>
// kernel: tpu_custom_call.1
= control target key start
LH: loop header
LB: loop body
LE: loop exit
PB: predicated region body
PF: predicated region fallthrough
CT: control target
= control target key end

     0   :  { %10 = vsyncpa [#allocation3], 0  ;;  %s1126_s0 = inlined_call_operand.vmem [shape: s32[16,1], index: 0, kind: input, shape index: {}]   ;;  %s1127_s1 = inlined_call_operand.hbm [shape: f32[64,128], index: 1, kind: input, shape index: {}]   ;;  %s1128_s2 = inlined_call_operand.hbm [shape: f32[64,128], index: 2, kind: input, shape index: {}]   ;;  %s1129_s3 = inlined_call_operand.hbm [shape: f32[16,128], index: 3, kind: output, shape index: {0}]   ;;  %s1130_s4 = inlined_call_operand.hbm [shape: f32[16,128], index: 4, kind: output, shape index: {1}]  }
   0x1   :  { %11 = vsyncpa [#allocation6], 0 }
   0x2   :  { %12 = vsyncpa [#allocation4], 0 }
   0x3   :  { %14 = vsyncpa [#allocation4 + $0x1], 0 }
   0x4   :  { %15 = vsyncpa [#allocation9], 0 }
   0x5   :  { %17 = vsyncpa [#allocation9 + $0x1], 0  ;;  %s921_s15 = smov 0   ;;  %s923_s16 = smov 0  }
   0x6   :  { %s925_s17 = smov 0   ;;  %s927_s18 = smov 0  }
   0x7 LB: > { %s942_s19 = sadd.s32 4294967295, %s884_s18   ;;  %s554_s20 = sadd.s32 4294967294, %s884_s18   ;;  %s884_s18 = sphi %s927_s18, %s1148_s18   ;;  %s880_s17 = sphi %s925_s17, %s1147_s17   ;;  %s876_s16 = sphi %s923_s16, %s1146_s16   ;;  %s872_s15 = sphi %s921_s15, %s1145_s15  }
   0x8   : > { %s946_s21 = sadd.s32 1, %s884_s18   ;;  %s98_s22 = sadd.s32 1, %s880_s17 }
   0x9   : > { %s95_s23 = ssub.s32 %s884_s18, %s946_s21  ;;  %p108_p0 = scmp.ne.s32.totalorder %s880_s17, %s876_s16 }
   0xa   : > { %p96_p1 = scmp.eq.s32.totalorder %s95_s23, 0  ;;  %p109_p2 = scmp.eq.s32.totalorder %s942_s19, 1 }
   0xb   : > { %p114_p3 = scmp.ne.s32.totalorder %s876_s16, %s872_s15  ;;  %p115_p4 = scmp.eq.s32.totalorder %s554_s20, 1 }
   0xc   : > { %s957_s24 = scalar_select %p96_p1, %s880_s17, %s98_s22  }
   0xd   : > { %p959_p5 = por %p109_p2, %p108_p0  ;;  %p963_p6 = por %p115_p4, %p114_p3 }
   0xe   : > { %p555_p7 = scmp.ge.s32.totalorder %s884_s18, 1  ;;  %p148_p8 = scmp.lt.s32.totalorder %s884_s18, 3 }
   0xf   : > { %s1134_s25 = scalar_select %p959_p5, 1, 0 }
  0x10   : > { %s1135_s26 = scalar_select %p963_p6, 1, 0 }
  0x11   : > { %p1131_p9 = scmp.eq.s32.totalorder %s942_s19, 0  ;;  %p970_p10 = pnand %p555_p7, %p148_p8 }
  0x12   : > { %s886_s28 = smov [#allocation2]   ;;  %s887_s5 = smov [#allocation5]  }
  0x13   : > { %s1136_s27 = scalar_select %p970_p10, 1, 0 }
  0x14   : > { %s160_s29 = sshll.u32 %s886_s28, 4  ;;  %p666_p11 = pneg %p970_p10  ;;  %s161_s29 = int_to_ptr.vmem [resolvable:$true] %s160_s29 }
  0x15   : > { %s173_s6 = sshll.u32 %s887_s5, 4  ;;  %s726_s9 = scalar_lea.hbm %s1127_s1, 1024  ;;  %s982_s6 = int_to_ptr.vmem [resolvable:$true] %s173_s6 }
  0x16   : > { %p978_p12 = pnand %p1131_p9, %p666_p11  ;;  %p727_p13 = scmp.ne.s32.totalorder %s1127_s1, %s726_s9 }
  0x17   : > { %p733_p3 = scmp.lt.u32.totalorder %s726_s9, %s1127_s1 }
  0x18   : > { %p728_p0 = pneg %p978_p12 }
  0x1a   : > { %p729_p1 = pnand %p728_p0, %p727_p13 }
  0x1c   : > { %p730_p2 = pneg %p729_p1 }
  0x1e   : > { %p735_p4 = pnand %p733_p3, %p730_p2 }
  0x20   : > { %738 = shalt.err (!%p735_p4)
}
  0x21   : > { %s739_s14 = scalar_lea.vmem %s161_s29, 1024  ;;  %p747_p9 = scmp.lt.s32.totalorder %s161_s29, %s161_s29 }
  0x22   : > { %p740_p7 = scmp.ne.s32.totalorder %s161_s29, %s739_s14  ;;  %p748_p6 = scmp.lt.s32.totalorder %s739_s14, %s739_s14 }
  0x24   : > { %p742_p8 = pnand %p740_p7, %p728_p0  ;;  %p749_p5 = por %p748_p6, %p747_p9 }
  0x26   : > { %p743_p11 = pneg %p742_p8 }
  0x28   : > { %p750_p10 = pnand %p749_p5, %p743_p11 }
  0x2a   : > { %753 = shalt.err (!%p750_p10)
}
  0x2b   : > { %s888_s20 = smov 128   ;;  %s889_s22 = smov 8  }
  0x2c   : > { %669 = dma.hbm_to_vmem [thread:$0]  (!%p978_p12), %s1127_s1, 1024, %s161_s29, [#allocation3], %s888_s20, %s888_s20, %s889_s22  }
  0x2d   : > { %s754_s8 = scalar_lea.hbm %s1128_s2, 1024 }
  0x2e   : > { %p755_p13 = scmp.ne.s32.totalorder %s1128_s2, %s754_s8  ;;  %p761_p9 = scmp.lt.u32.totalorder %s754_s8, %s1128_s2 }
  0x30   : > { %p757_p5 = pnand %p755_p13, %p728_p0 }
  0x32   : > { %p758_p6 = pneg %p757_p5 }
  0x34   : > { %p763_p10 = pnand %p761_p9, %p758_p6 }
  0x36   : > { %766 = shalt.err (!%p763_p10)
}
  0x37   : > { %s767_s29 = scalar_lea.vmem %s982_s6, 1024  ;;  %p775_p4 = scmp.lt.s32.totalorder %s982_s6, %s982_s6 }
  0x38   : > { %p768_p1 = scmp.ne.s32.totalorder %s982_s6, %s767_s29  ;;  %p776_p7 = scmp.lt.s32.totalorder %s767_s29, %s767_s29 }
  0x3a   : > { %p770_p2 = pnand %p768_p1, %p728_p0  ;;  %p777_p8 = por %p776_p7, %p775_p4 }
  0x3c   : > { %p771_p3 = pneg %p770_p2 }
  0x3e   : > { %p778_p11 = pnand %p777_p8, %p771_p3 }
  0x40   : > { %781 = shalt.err (!%p778_p11)
}
  0x41   : > { %672 = dma.hbm_to_vmem [thread:$0]  (!%p978_p12), %s1128_s2, 1024, %s982_s6, [#allocation6], %s888_s20, %s888_s20, %s889_s22  }
  0x42   : > { %p1138_p13 = scmp.ne.s32.totalorder %s1136_s27, 0 }
  0x43   : > { %p1139_p5 = scmp.eq.s32.totalorder (!%p1138_p13), %s942_s19, 0 }
  0x44   : > { %196 = sbr.rel (%p1138_p13) target bundleno = 470 (0x1d6), region = 32 }
  0x4b   : > { %855 = dma.done.wait (%p1139_p5), [#allocation3], 1024   ;;  %p1140_p0 = pmov %p1139_p5 }
  0x4d   : > { %857 = vsyncadd (%p1140_p0), [#allocation3], 4294966272  ;;  %p1141_p6 = pmov %p1140_p0 }
  0x4e   : > { %p1142_p9 = pmov %p1140_p0 }
  0x4f   : > { %859 = dma.done.wait (%p1141_p6), [#allocation6], 1024  }
  0x50   : > { %861 = vsyncadd (%p1142_p9), [#allocation6], 4294966272  ;;  %p230_p10 = scmp.lt.s32.totalorder %s942_s19, 1  ;;  %v890_v0 = vmov 0   ;;  %v891_v1 = vmov 0.0|0.0   ;;  %v247_v3 = vld [vmem:[#allocation2] sm:$0xff]  ;;  %v239_v30 = vlaneseq }
  0x51   : > { %725 = vset.pattern.permute.xlu0 %v890_v0  ;;  %630 = vmatprep.subr.bf16.mxu0 %v891_v1  ;;  %v248_v4 = vld [vmem:[#allocation2 + $0x8] sm:$0xff]  ;;  %v329_v6 = vld [vmem:[#allocation5] sm:$0xff]  ;;  %v249_v8 = vld [vmem:[#allocation2 + $0x10] sm:$0xff]  ;;  %vm892_vm2 = vmmov 0   ;;  %v893_v21 = vmov 0.0   ;;  %vm255_vm3 = vcmask 523264  }
  0x52   : > { %s231_s27 = scalar_select %p230_p10, %s942_s19, 1  ;;  %642 = vmatprep.subr.bf16.mxu1 %v891_v1  ;;  %v631_v5 = vpack.c.bf16 %v248_v4, %v247_v3  ;;  %v330_v7 = vld [vmem:[#allocation5 + $0x8] sm:$0xff]  ;;  %v250_v11 = vld [vmem:[#allocation2 + $0x18] sm:$0xff]  ;;  %v331_v12 = vld [vmem:[#allocation5 + $0x10] sm:$0xff]  ;;  %608 = vmatprep.mubr.msk.f32.mxu0 %vm892_vm2, %v893_v21  ;;  %v240_v31 = vand.u32 127, %v239_v30 }
  0x53   : > { %v643_v10 = vpack.c.bf16 %v330_v7, %v329_v6  ;;  %v332_v13 = vld [vmem:[#allocation5 + $0x18] sm:$0xff]  ;;  %v634_v14 = vpack.c.bf16 %v250_v11, %v249_v8  ;;  %v251_v17 = vld [vmem:[#allocation2 + $0x20] sm:$0xff]  ;;  %v252_v18 = vld [vmem:[#allocation2 + $0x28] sm:$0xff]  ;;  %627 = vmatprep.mubr.msk.f32.mxu1 %vm892_vm2, %v893_v21  ;;  %s1047_s23 = sand.u32 1, %s876_s16   ;;  %s570_s10 = sshll.u32 %s942_s19, 7 }
  0x54   : > { %s564_s30 = sshll.u32 %s231_s27, 3  ;;  %632 = vmatpush3.bf16.msra.mxu0 %v631_v5  ;;  %v646_v16 = vpack.c.bf16 %v332_v13, %v331_v12  ;;  %v333_v19 = vld [vmem:[#allocation5 + $0x20] sm:$0xff]  ;;  %v334_v20 = vld [vmem:[#allocation5 + $0x28] sm:$0xff]  ;;  %v637_v22 = vpack.c.bf16 %v252_v18, %v251_v17  ;;  %v253_v24 = vld [vmem:[#allocation2 + $0x30] sm:$0xff]  ;;  %s562_s28 = sshll.u32 %s1047_s23, 3 }
  0x55   : > { %s233_s22 = scalar_lea.vmem %s1126_s0, %s564_s30  ;;  %644 = vmatpush3.bf16.msra.mxu1 %v643_v10  ;;  %633 = vmatprep.subr.bf16.mxu0 %v891_v1  ;;  %v649_v23 = vpack.c.bf16 %v334_v20, %v333_v19  ;;  %v254_v25 = vld [vmem:[#allocation2 + $0x38] sm:$0xff]  ;;  %v335_v26 = vld [vmem:[#allocation5 + $0x30] sm:$0xff]  ;;  %s222_s5 = scalar_lea.vmem [#allocation7], %s562_s28 }
  0x56   : > { %v234_v2 = vld [vmem:[%s233_s22] sm:$0xff]  ;;  %645 = vmatprep.subr.bf16.mxu1 %v891_v1  ;;  %v336_v27 = vld [vmem:[#allocation5 + $0x38] sm:$0xff]  ;;  %v640_v28 = vpack.c.bf16 %v254_v25, %v253_v24  ;;  %s428_s7 = sshll.u32 %s222_s5, 4  ;;  %s229_s8 = scalar_lea.vmem [#allocation8], %s562_s28  ;;  %s1051_s7 = int_to_ptr.vmem [resolvable:$true] %s428_s7 }
  0x57   : > { %vm235_vm0 = vcmp.gt.s32.totalorder %v234_v2, 0  ;;  %v652_v29 = vpack.c.bf16 %v336_v27, %v335_v26  ;;  %s441_s9 = sshll.u32 %s229_s8, 4  ;;  %s1058_s29 = scalar_lea.hbm %s1129_s3, %s570_s10  ;;  %s1053_s9 = int_to_ptr.vmem [resolvable:$true] %s441_s9 }
  0x58   : > { %v236_v9 = vsel %vm235_vm0, %v234_v2, 0  ;;  %635 = vmatpush3.bf16.msra.mxu0 %v634_v14  ;;  %s1063_s27 = scalar_lea.hbm %s1130_s4, %s570_s10  ;;  %s410_s19 = scalar_lea.sflag [#allocation4], %s1047_s23 }
  0x59   : > { %vm237_vm1 = vcmp.lt.s32.totalorder %v236_v9, 63  ;;  %647 = vmatpush3.bf16.msra.mxu1 %v646_v16  ;;  %636 = vmatprep.subr.bf16.mxu0 %v891_v1  ;;  %s782_s30 = scalar_lea.vmem %s1051_s7, 128  ;;  %p1143_p1 = scmp.ne.s32.totalorder %s1134_s25, 0 }
  0x5a   : > { %v238_v15 = vsel %vm237_vm1, %v236_v9, 63  ;;  %648 = vmatprep.subr.bf16.mxu1 %v891_v1  ;;  %p783_p12 = scmp.ne.s32.totalorder %s1051_s7, %s782_s30  ;;  %s894_s6 = smov [#allocation7]  }
  0x5b   : > { %242 = vperm.xlu0 %725, %v238_v15   ;;  %s786_s20 = sshll.u32 %s894_s6, 4  ;;  %s787_s20 = int_to_ptr.vmem [resolvable:$false] %s786_s20 }
  0x5c   : > { %638 = vmatpush3.bf16.msra.mxu0 %v637_v22  ;;  %p784_p2 = pnand %p783_p12, %p1143_p1  ;;  %s788_s22 = scalar_lea.vmem %s787_s20, 256 }
  0x5d   : > { %650 = vmatpush3.bf16.msra.mxu1 %v649_v23  ;;  %639 = vmatprep.subr.bf16.mxu0 %v891_v1  ;;  %p789_p4 = scmp.lt.s32.totalorder %s1051_s7, %s787_s20  ;;  %p790_p7 = scmp.lt.s32.totalorder %s788_s22, %s782_s30 }
  0x5e   : > { %651 = vmatprep.subr.bf16.mxu1 %v891_v1  ;;  %p785_p3 = pneg %p784_p2 }
  0x5f   : > { %p791_p8 = por %p790_p7, %p789_p4 }
  0x60   : > { %641 = vmatpush3.bf16.msra.mxu0 %v640_v28 }
  0x61   : > { %653 = vmatpush3.bf16.msra.mxu1 %v652_v29  ;;  %p792_p11 = pnand %p791_p8, %p785_p3 }
  0xda   : > { %v243_v32 = vpop.permute.xlu0 %242 }
  0xdb   : > { %vm244_vm4 = vcmp.eq.s32.totalorder %v240_v31, %v243_v32 }
  0xdc   : > { %v565_v33 = vsel %vm244_vm4, 1.0, %v893_v21 }
  0xdd   : > { %609 = vmatmul.mubr.msk.f32.vlgmr.msra.gmra.mrb[0].mxu0 %vm255_vm3, %v565_v33  ;;  %628 = vmatmul.mubr.msk.f32.vlgmr.msra.gmra.mrb[0].mxu1 %vm255_vm3, %v565_v33 }
 0x1b0   : > { %v325_v34 = vpop.f32.mrb[0].mxu0  ;;  %v403_v35 = vpop.f32.mrb[0].mxu1 }
 0x1b1   : > { %407 = vst [vmem:[%s222_s5] sm:$0xff] %v325_v34  ;;  %408 = vst [vmem:[%s229_s8] sm:$0xff] %v403_v35  ;;  %v610_v36 = vpop.f32.mrb[1].mxu0  ;;  %v629_v37 = vpop.f32.mrb[1].mxu1 }
 0x1b2   : > { %795 = shalt.err (!%p792_p11)
}
 0x1b3   : > { %s796_s28 = scalar_lea.hbm %s1058_s29, 128  ;;  %s800_s10 = scalar_lea.hbm %s1129_s3, 256 }
 0x1b4   : > { %p797_p13 = scmp.ne.s32.totalorder %s1058_s29, %s796_s28  ;;  %p801_p6 = scmp.lt.u32.totalorder %s1058_s29, %s1129_s3 }
 0x1b5   : > { %p802_p9 = scmp.lt.u32.totalorder %s800_s10, %s796_s28  ;;  %p804_p12 = scmp.lt.u32.totalorder %s796_s28, %s1058_s29 }
 0x1b6   : > { %p798_p5 = pnand %p797_p13, %p1143_p1 }
 0x1b7   : > { %p803_p10 = por %p802_p9, %p801_p6 }
 0x1b8   : > { %p799_p0 = pneg %p798_p5 }
 0x1b9   : > { %p805_p2 = por %p804_p12, %p803_p10 }
 0x1bb   : > { %p806_p3 = pnand %p805_p2, %p799_p0 }
 0x1bd   : > { %809 = shalt.err (!%p806_p3)
}
 0x1be   : > { %662 = dma.vmem_to_hbm [thread:$0]  (%p1143_p1), %s1051_s7, 128, %s1058_s29, %s410_s19  }
 0x1bf   : > { %s415_s13 = scalar_lea.sflag [#allocation9], %s1047_s23  ;;  %s810_s14 = scalar_lea.vmem %s1053_s9, 128 }
 0x1c0   : > { %p811_p4 = scmp.ne.s32.totalorder %s1053_s9, %s810_s14  ;;  %s895_s30 = smov [#allocation8]  }
 0x1c1   : > { %s814_s6 = sshll.u32 %s895_s30, 4  ;;  %s815_s6 = int_to_ptr.vmem [resolvable:$false] %s814_s6 }
 0x1c2   : > { %p812_p7 = pnand %p811_p4, %p1143_p1  ;;  %s816_s20 = scalar_lea.vmem %s815_s6, 256 }
 0x1c3   : > { %p817_p11 = scmp.lt.s32.totalorder %s1053_s9, %s815_s6  ;;  %p818_p13 = scmp.lt.s32.totalorder %s816_s20, %s810_s14 }
 0x1c4   : > { %p813_p8 = pneg %p812_p7 }
 0x1c5   : > { %p819_p5 = por %p818_p13, %p817_p11 }
 0x1c7   : > { %p820_p0 = pnand %p819_p5, %p813_p8 }
 0x1c9   : > { %823 = shalt.err (!%p820_p0)
}
 0x1ca   : > { %s824_s23 = scalar_lea.hbm %s1063_s27, 128  ;;  %s828_s19 = scalar_lea.hbm %s1130_s4, 256 }
 0x1cb   : > { %p825_p6 = scmp.ne.s32.totalorder %s1063_s27, %s824_s23  ;;  %p829_p12 = scmp.lt.u32.totalorder %s1063_s27, %s1130_s4 }
 0x1cc   : > { %p830_p2 = scmp.lt.u32.totalorder %s828_s19, %s824_s23  ;;  %p832_p4 = scmp.lt.u32.totalorder %s824_s23, %s1063_s27 }
 0x1cd   : > { %p826_p9 = pnand %p825_p6, %p1143_p1 }
 0x1ce   : > { %p831_p3 = por %p830_p2, %p829_p12 }
 0x1cf   : > { %p827_p10 = pneg %p826_p9 }
 0x1d0   : > { %p833_p7 = por %p832_p4, %p831_p3 }
 0x1d2   : > { %p834_p8 = pnand %p833_p7, %p827_p10 }
 0x1d4   : > { %837 = shalt.err (!%p834_p8)
}
 0x1d5   : > { %663 = dma.vmem_to_hbm [thread:$0]  (%p1143_p1), %s1053_s9, 128, %s1063_s27, %s415_s13  }
 0x1d6 PF: > { %p684_p11 = scmp.ge.s32.totalorder %s884_s18, 2  ;;  %s453_s5 = sand.u32 1, %s872_s15  }
 0x1d7   : > { %p1144_p13 = scmp.ne.s32.totalorder %s1135_s26, 0  ;;  %s454_s8 = scalar_lea.sflag [#allocation4], %s453_s5 }
 0x1d9   : > { %p674_p5 = pnand %p684_p11, %p1144_p13 }
 0x1db   : > { %863 = dma.done.wait (!%p674_p5), %s454_s8, 128  }
 0x1dc   : > { %865 = vsyncadd (!%p674_p5), %s454_s8, 4294967168  ;;  %s463_s10 = scalar_lea.sflag [#allocation9], %s453_s5 }
 0x1dd   : > { %867 = dma.done.wait (!%p674_p5), %s463_s10, 128  }
 0x1de   : > { %869 = vsyncadd (!%p674_p5), %s463_s10, 4294967168  ;;  %p20_p1 = scmp.ge.s32.totalorder %s946_s21, 4   ;;  %s1145_s15 = smov %s876_s16 }
 0x1df   : > { %s1146_s16 = smov %s880_s17  ;;  %s1147_s17 = smov %s957_s24 }
 0x1e0   : > { %s1148_s18 = smov %s946_s21  ;;  %22 = sbr.rel (!%p20_p1) target bundleno = 7 (0x7), region = 93 }
 0x1e7   :  { %468 = vsyncpa [#allocation3], 1 }
 0x1e8   :  { %470 = vsyncpa [#allocation3 + $0x1], 1 }
 0x1e9   :  { %471 = vsyncpa [#allocation6], 1 }
 0x1ea   :  { %472 = vsyncpa [#allocation4], 1 }
 0x1eb   :  { %474 = vsyncpa [#allocation4 + $0x1], 1 }
 0x1ec   :  { %475 = vsyncpa [#allocation9], 1 }
 0x1ed   :  { %477 = vsyncpa [#allocation9 + $0x1], 1 }

</bundles_post_ra>
